<compile_context>
chip_gen: v5e
topology: v5e:2x2
jax: 0.10.0
libtpu: 0.0.40
codegen_flags: <defaults>
</compile_context>

<pallas_src>
import math

import jax
import jax.numpy as jnp
from jax.experimental import pallas as pl
from jax.experimental.pallas import tpu as pltpu

IN_FEATURES = 21
_K_PAD = 32      # pad the 21-wide input feature dim to 32 (zero-filled)
_LANE = 128      # channel padding granularity for lane-dense output stores


def _round_up(n, m):
    return ((n + m - 1) // m) * m


def beta_mlp_kernel(x_ref, w1_ref, b1_ref, w2_ref, b2_ref, o_ref):
    # x_ref: (tm, Kp) f32 | w1_ref: (Kp, Cp) bf16 | b1_ref: (1, Cp) f32
    # w2_ref: (Cp, Cp) bf16 | b2_ref: (1, Cp) f32 | o_ref: (tm, Cp)
    x = x_ref[...].astype(jnp.bfloat16)                                   # bf16 MXU operands
    h = jnp.dot(x, w1_ref[...], preferred_element_type=jnp.float32)      # f32 accumulate
    h = jnp.maximum(h + b1_ref[...], 0.0)                                 # bias + ReLU in f32 (VPU)
    y = jnp.dot(h.astype(jnp.bfloat16), w2_ref[...],
                preferred_element_type=jnp.float32)
    y = jnp.maximum(y + b2_ref[...], 0.0)
    o_ref[...] = y.astype(o_ref.dtype)


def _build_call(B, Kp, Cp, tm, out_dtype, single_buffer_weights, vmem_limit_bytes):
    def const_spec(shape):
        # Weights/biases have a constant index_map (never change across grid steps);
        # single-buffering halves their resident VMEM footprint.
        if single_buffer_weights:
            return pl.BlockSpec(shape, lambda i: (0, 0), pipeline_mode=pl.Buffered(1))
        return pl.BlockSpec(shape, lambda i: (0, 0))

    cost = pl.CostEstimate(
        flops=2 * B * (Kp * Cp + Cp * Cp),
        transcendentals=0,
        bytes_accessed=(B * Kp * 4) + (Kp * Cp + Cp * Cp) * 2 + 2 * Cp * 4 + (B * Cp * 4),
    )
    return pl.pallas_call(
        beta_mlp_kernel,
        out_shape=jax.ShapeDtypeStruct((B, Cp), out_dtype),
        grid_spec=pltpu.PrefetchScalarGridSpec(
            num_scalar_prefetch=0,
            grid=(pl.cdiv(B, tm),),
            in_specs=[
                pl.BlockSpec((tm, Kp), lambda i: (i, 0)),   # x tile over batch
                const_spec((Kp, Cp)),                       # W1 (resident)
                const_spec((1, Cp)),                        # b1
                const_spec((Cp, Cp)),                       # W2 (resident)
                const_spec((1, Cp)),                        # b2
            ],
            out_specs=pl.BlockSpec((tm, Cp), lambda i: (i, 0)),
        ),
        compiler_params=pltpu.CompilerParams(
            dimension_semantics=("parallel",),      # megacore-shard the batch grid (v7x)
            vmem_limit_bytes=vmem_limit_bytes,
        ),
        cost_estimate=cost,
    )


def beta_mlp(x, w1, b1, w2, b2, *, tm=512, single_buffer_weights=True):
    """x: (B, 21); w1: (21, C) (pre-transposed); b1: (C,); w2: (C, C); b2: (C,).
    Returns (B, C) = ReLU(ReLU(x @ w1 + b1) @ w2 + b2)."""
    B, K = x.shape
    assert K == IN_FEATURES
    C = w1.shape[1]

    # Layout padding (zero-filled, so the math is unchanged):
    #   K 21 -> 32, C -> multiple of 128 (lane-dense output stores).
    Kp = max(_K_PAD, _round_up(K, 8))
    Cp = _round_up(C, _LANE)
    xp = jnp.pad(x, ((0, 0), (0, Kp - K))) if Kp != K else x
    w1p = jnp.pad(w1, ((0, Kp - K), (0, Cp - C))).astype(jnp.bfloat16)
    b1p = jnp.pad(b1, (0, Cp - C)).reshape(1, Cp).astype(jnp.float32)
    w2p = jnp.pad(w2, ((0, Cp - C), (0, Cp - C))).astype(jnp.bfloat16)
    b2p = jnp.pad(b2, (0, Cp - C)).reshape(1, Cp).astype(jnp.float32)

    # Batch tile: MXU-sized (multiple of 8 sublanes), never bigger than needed.
    tm = _round_up(max(8, min(tm, _round_up(B, 8))), 8)

    # Explicit VMEM budget: single/double-buffered weights + double-buffered x/out tiles.
    wbufs = 1 if single_buffer_weights else 2
    need = wbufs * ((Kp * Cp + Cp * Cp) * 2 + 2 * Cp * 4) + 2 * tm * (Kp + Cp) * 4
    vmem_limit_bytes = int(min(48 << 20, max(32 << 20, need + (4 << 20))))

    args = (xp, w1p, b1p, w2p, b2p)
    try:
        out = _build_call(B, Kp, Cp, tm, x.dtype, single_buffer_weights,
                          vmem_limit_bytes)(*args)
    except Exception:
        if not single_buffer_weights:
            raise
        # pl.Buffered(1) unsupported on this jax/Mosaic build -> default buffering.
        out = _build_call(B, Kp, Cp, tm, x.dtype, False, vmem_limit_bytes)(*args)
    return out[:, :C] if Cp != C else out


def init_params(key, channels):
    """torch nn.Linear default init: U(-1/sqrt(fan_in), 1/sqrt(fan_in)).
    Weights are returned already transposed to (in, out)."""
    k1, k2, k3, k4 = jax.random.split(key, 4)
    bound1 = 1.0 / math.sqrt(IN_FEATURES)
    w1 = jax.random.uniform(k1, (IN_FEATURES, channels), jnp.float32, -bound1, bound1)
    b1 = jax.random.uniform(k2, (channels,), jnp.float32, -bound1, bound1)
    bound2 = 1.0 / math.sqrt(channels)
    w2 = jax.random.uniform(k3, (channels, channels), jnp.float32, -bound2, bound2)
    b2 = jax.random.uniform(k4, (channels,), jnp.float32, -bound2, bound2)
    return w1, b1, w2, b2


def beta_mlp_ref(x, w1, b1, w2, b2):
    h = jnp.maximum(x @ w1 + b1, 0.0)
    return jnp.maximum(h @ w2 + b2, 0.0)


if __name__ == "__main__":
    key = jax.random.PRNGKey(0)
    k_x, k_p = jax.random.split(key)

    B = 72     # not a multiple of tm -> exercises the partial tail-block clip
    C = 32     # < 128 -> exercises the channel lane-padding + slice-off path

    x = jax.random.normal(k_x, (B, IN_FEATURES), jnp.float32)
    w1, b1, w2, b2 = init_params(k_p, C)

    out = beta_mlp(x, w1, b1, w2, b2, tm=32)   # small tm here -> 3 grid steps
    out = jax.block_until_ready(out)

    ref = beta_mlp_ref(x, w1, b1, w2, b2)
    assert out.shape == (B, C)
    # bf16 MXU operands (f32 accumulation) -> looser tolerance than pure-f32.
    assert jnp.allclose(out, ref, atol=5e-2, rtol=5e-2), "mismatch vs reference"

    print("KERNEL_OK")
</pallas_src>

<mosaic_0001>
module attributes {stable_mosaic.version = 11 : i64} {
  func.func @beta_mlp_kernel(%arg0: i32, %arg1: memref<32x32xf32, #tpu.memory_space<vmem>>, %arg2: memref<32x128xbf16, #tpu.memory_space<vmem>>, %arg3: memref<1x128xf32, #tpu.memory_space<vmem>>, %arg4: memref<128x128xbf16, #tpu.memory_space<vmem>>, %arg5: memref<1x128xf32, #tpu.memory_space<vmem>>, %arg6: memref<32x128xf32, #tpu.memory_space<vmem>>) attributes {dimension_semantics = [#tpu.dimension_semantics<parallel>], iteration_bounds = array<i64: 3>, scalar_prefetch = 0 : i64, scratch_operands = 0 : i64, tpu.core_type = #tpu.core_type<tc>, window_params = [{transform_indices = @transform_0, window_bounds = array<i64: 32, 32>}, {pipeline_mode = #tpu.pipeline_mode<synchronous>, transform_indices = @transform_1, window_bounds = array<i64: 32, 128>}, {pipeline_mode = #tpu.pipeline_mode<synchronous>, transform_indices = @transform_2, window_bounds = array<i64: 1, 128>}, {pipeline_mode = #tpu.pipeline_mode<synchronous>, transform_indices = @transform_3, window_bounds = array<i64: 128, 128>}, {pipeline_mode = #tpu.pipeline_mode<synchronous>, transform_indices = @transform_4, window_bounds = array<i64: 1, 128>}, {transform_indices = @transform_5, window_bounds = array<i64: 32, 128>}]} {
    %c0 = arith.constant 0 : index
    %c0_0 = arith.constant 0 : index
    %0 = vector.load %arg1[%c0, %c0_0] : memref<32x32xf32, #tpu.memory_space<vmem>>, vector<32x32xf32>
    %1 = arith.truncf %0 : vector<32x32xf32> to vector<32x32xbf16>
    %c0_1 = arith.constant 0 : index
    %c0_2 = arith.constant 0 : index
    %2 = vector.load %arg2[%c0_1, %c0_2] : memref<32x128xbf16, #tpu.memory_space<vmem>>, vector<32x128xbf16>
    %cst = arith.constant dense<0.000000e+00> : vector<32x128xf32>
    %3 = tpu.matmul %1, %2, %cst {dimension_numbers = #tpu.dot_dimension_numbers<[1], [0], [0], [1], [0, 0, 1, 1], [], []>} : vector<32x32xbf16>, vector<32x128xbf16>, vector<32x128xf32> -> vector<32x128xf32>
    %c0_3 = arith.constant 0 : index
    %c0_4 = arith.constant 0 : index
    %4 = vector.load %arg3[%c0_3, %c0_4] : memref<1x128xf32, #tpu.memory_space<vmem>>, vector<1x128xf32>
    %5 = vector.broadcast %4 : vector<1x128xf32> to vector<32x128xf32>
    %6 = arith.addf %3, %5 : vector<32x128xf32>
    %cst_5 = arith.constant 0.000000e+00 : f32
    %7 = vector.broadcast %cst_5 : f32 to vector<32x128xf32>
    %8 = arith.maximumf %6, %7 : vector<32x128xf32>
    %9 = arith.truncf %8 : vector<32x128xf32> to vector<32x128xbf16>
    %c0_6 = arith.constant 0 : index
    %c0_7 = arith.constant 0 : index
    %10 = vector.load %arg4[%c0_6, %c0_7] : memref<128x128xbf16, #tpu.memory_space<vmem>>, vector<128x128xbf16>
    %cst_8 = arith.constant dense<0.000000e+00> : vector<32x128xf32>
    %11 = tpu.matmul %9, %10, %cst_8 {dimension_numbers = #tpu.dot_dimension_numbers<[1], [0], [0], [1], [0, 0, 1, 1], [], []>} : vector<32x128xbf16>, vector<128x128xbf16>, vector<32x128xf32> -> vector<32x128xf32>
    %c0_9 = arith.constant 0 : index
    %c0_10 = arith.constant 0 : index
    %12 = vector.load %arg5[%c0_9, %c0_10] : memref<1x128xf32, #tpu.memory_space<vmem>>, vector<1x128xf32>
    %13 = vector.broadcast %12 : vector<1x128xf32> to vector<32x128xf32>
    %14 = arith.addf %11, %13 : vector<32x128xf32>
    %cst_11 = arith.constant 0.000000e+00 : f32
    %15 = vector.broadcast %cst_11 : f32 to vector<32x128xf32>
    %16 = arith.maximumf %14, %15 : vector<32x128xf32>
    %c0_12 = arith.constant 0 : index
    %c0_13 = arith.constant 0 : index
    %17 = vector.load %arg6[%c0_12, %c0_13] : memref<32x128xf32, #tpu.memory_space<vmem>>, vector<32x128xf32>
    tpu.vector_store %arg6[%c0_12, %c0_13], %16 {strides = array<i32>} : memref<32x128xf32, #tpu.memory_space<vmem>>, vector<32x128xf32>,
    return
  }
  func.func @transform_0(%arg0: i32) -> (i32, i32) {
    %c0_i32 = arith.constant 0 : i32
    %c0_i32_0 = arith.constant 0 : i32
    return %arg0, %c0_i32 : i32, i32
  }
  func.func @transform_1(%arg0: i32) -> (i32, i32) {
    %c0_i32 = arith.constant 0 : i32
    %c0_i32_0 = arith.constant 0 : i32
    %c0_i32_1 = arith.constant 0 : i32
    return %c0_i32, %c0_i32_0 : i32, i32
  }
  func.func @transform_2(%arg0: i32) -> (i32, i32) {
    %c0_i32 = arith.constant 0 : i32
    %c0_i32_0 = arith.constant 0 : i32
    %c0_i32_1 = arith.constant 0 : i32
    return %c0_i32, %c0_i32_0 : i32, i32
  }
  func.func @transform_3(%arg0: i32) -> (i32, i32) {
    %c0_i32 = arith.constant 0 : i32
    %c0_i32_0 = arith.constant 0 : i32
    %c0_i32_1 = arith.constant 0 : i32
    return %c0_i32, %c0_i32_0 : i32, i32
  }
  func.func @transform_4(%arg0: i32) -> (i32, i32) {
    %c0_i32 = arith.constant 0 : i32
    %c0_i32_0 = arith.constant 0 : i32
    %c0_i32_1 = arith.constant 0 : i32
    return %c0_i32, %c0_i32_0 : i32, i32
  }
  func.func @transform_5(%arg0: i32) -> (i32, i32) {
    %c0_i32 = arith.constant 0 : i32
    %c0_i32_0 = arith.constant 0 : i32
    return %arg0, %c0_i32 : i32, i32
  }
}

module attributes {stable_mosaic.version = 11 : i64} {
  func.func @beta_mlp_kernel(%arg0: i32, %arg1: memref<32x32xf32, #tpu.memory_space<vmem>>, %arg2: memref<32x128xbf16, #tpu.memory_space<vmem>>, %arg3: memref<1x128xf32, #tpu.memory_space<vmem>>, %arg4: memref<128x128xbf16, #tpu.memory_space<vmem>>, %arg5: memref<1x128xf32, #tpu.memory_space<vmem>>, %arg6: memref<32x128xf32, #tpu.memory_space<vmem>>) attributes {dimension_semantics = [#tpu.dimension_semantics<parallel>], iteration_bounds = array<i64: 3>, scalar_prefetch = 0 : i64, scratch_operands = 0 : i64, tpu.core_type = #tpu.core_type<tc>, window_params = [{transform_indices = @transform_0, window_bounds = array<i64: 32, 32>}, {pipeline_mode = #tpu.pipeline_mode<synchronous>, transform_indices = @transform_1, window_bounds = array<i64: 32, 128>}, {pipeline_mode = #tpu.pipeline_mode<synchronous>, transform_indices = @transform_2, window_bounds = array<i64: 1, 128>}, {pipeline_mode = #tpu.pipeline_mode<synchronous>, transform_indices = @transform_3, window_bounds = array<i64: 128, 128>}, {pipeline_mode = #tpu.pipeline_mode<synchronous>, transform_indices = @transform_4, window_bounds = array<i64: 1, 128>}, {transform_indices = @transform_5, window_bounds = array<i64: 32, 128>}]} {
    %c0 = arith.constant 0 : index
    %c0_0 = arith.constant 0 : index
    %0 = vector.load %arg1[%c0, %c0_0] : memref<32x32xf32, #tpu.memory_space<vmem>>, vector<32x32xf32>
    %1 = arith.truncf %0 : vector<32x32xf32> to vector<32x32xbf16>
    %c0_1 = arith.constant 0 : index
    %c0_2 = arith.constant 0 : index
    %2 = vector.load %arg2[%c0_1, %c0_2] : memref<32x128xbf16, #tpu.memory_space<vmem>>, vector<32x128xbf16>
    %cst = arith.constant dense<0.000000e+00> : vector<32x128xf32>
    %3 = tpu.matmul %1, %2, %cst {dimension_numbers = #tpu.dot_dimension_numbers<[1], [0], [0], [1], [0, 0, 1, 1], [], []>} : vector<32x32xbf16>, vector<32x128xbf16>, vector<32x128xf32> -> vector<32x128xf32>
    %c0_3 = arith.constant 0 : index
    %c0_4 = arith.constant 0 : index
    %4 = vector.load %arg3[%c0_3, %c0_4] : memref<1x128xf32, #tpu.memory_space<vmem>>, vector<1x128xf32>
    %5 = vector.broadcast %4 : vector<1x128xf32> to vector<32x128xf32>
    %6 = arith.addf %3, %5 : vector<32x128xf32>
    %cst_5 = arith.constant 0.000000e+00 : f32
    %7 = vector.broadcast %cst_5 : f32 to vector<32x128xf32>
    %8 = arith.maximumf %6, %7 : vector<32x128xf32>
    %9 = arith.truncf %8 : vector<32x128xf32> to vector<32x128xbf16>
    %c0_6 = arith.constant 0 : index
    %c0_7 = arith.constant 0 : index
    %10 = vector.load %arg4[%c0_6, %c0_7] : memref<128x128xbf16, #tpu.memory_space<vmem>>, vector<128x128xbf16>
    %cst_8 = arith.constant dense<0.000000e+00> : vector<32x128xf32>
    %11 = tpu.matmul %9, %10, %cst_8 {dimension_numbers = #tpu.dot_dimension_numbers<[1], [0], [0], [1], [0, 0, 1, 1], [], []>} : vector<32x128xbf16>, vector<128x128xbf16>, vector<32x128xf32> -> vector<32x128xf32>
    %c0_9 = arith.constant 0 : index
    %c0_10 = arith.constant 0 : index
    %12 = vector.load %arg5[%c0_9, %c0_10] : memref<1x128xf32, #tpu.memory_space<vmem>>, vector<1x128xf32>
    %13 = vector.broadcast %12 : vector<1x128xf32> to vector<32x128xf32>
    %14 = arith.addf %11, %13 : vector<32x128xf32>
    %cst_11 = arith.constant 0.000000e+00 : f32
    %15 = vector.broadcast %cst_11 : f32 to vector<32x128xf32>
    %16 = arith.maximumf %14, %15 : vector<32x128xf32>
    %c0_12 = arith.constant 0 : index
    %c0_13 = arith.constant 0 : index
    %17 = vector.load %arg6[%c0_12, %c0_13] : memref<32x128xf32, #tpu.memory_space<vmem>>, vector<32x128xf32>
    tpu.vector_store %arg6[%c0_12, %c0_13], %16 {strides = array<i32>} : memref<32x128xf32, #tpu.memory_space<vmem>>, vector<32x128xf32>,
    return
  }
  func.func @transform_0(%arg0: i32) -> (i32, i32) {
    %c0_i32 = arith.constant 0 : i32
    %c0_i32_0 = arith.constant 0 : i32
    return %arg0, %c0_i32 : i32, i32
  }
  func.func @transform_1(%arg0: i32) -> (i32, i32) {
    %c0_i32 = arith.constant 0 : i32
    %c0_i32_0 = arith.constant 0 : i32
    %c0_i32_1 = arith.constant 0 : i32
    return %c0_i32, %c0_i32_0 : i32, i32
  }
  func.func @transform_2(%arg0: i32) -> (i32, i32) {
    %c0_i32 = arith.constant 0 : i32
    %c0_i32_0 = arith.constant 0 : i32
    %c0_i32_1 = arith.constant 0 : i32
    return %c0_i32, %c0_i32_0 : i32, i32
  }
  func.func @transform_3(%arg0: i32) -> (i32, i32) {
    %c0_i32 = arith.constant 0 : i32
    %c0_i32_0 = arith.constant 0 : i32
    %c0_i32_1 = arith.constant 0 : i32
    return %c0_i32, %c0_i32_0 : i32, i32
  }
  func.func @transform_4(%arg0: i32) -> (i32, i32) {
    %c0_i32 = arith.constant 0 : i32
    %c0_i32_0 = arith.constant 0 : i32
    %c0_i32_1 = arith.constant 0 : i32
    return %c0_i32, %c0_i32_0 : i32, i32
  }
  func.func @transform_5(%arg0: i32) -> (i32, i32) {
    %c0_i32 = arith.constant 0 : i32
    %c0_i32_0 = arith.constant 0 : i32
    return %arg0, %c0_i32 : i32, i32
  }
}

</mosaic_0001>

<bundles_post_ra>
// kernel: tpu_custom_call.1
= control target key start
LH: loop header
LB: loop body
LE: loop exit
PB: predicated region body
PF: predicated region fallthrough
CT: control target
= control target key end

     0   :  { %10 = vsyncpa [#allocation3], 0  ;;  %s869_s0 = inlined_call_operand.vmem [shape: f32[72,32], index: 0, kind: input, shape index: {}]   ;;  %s870_s1 = inlined_call_operand.vmem [shape: bf16[32,128], index: 1, kind: input, shape index: {}]   ;;  %s871_s2 = inlined_call_operand.vmem [shape: f32[1,128], index: 2, kind: input, shape index: {}]   ;;  %s872_s3 = inlined_call_operand.vmem [shape: bf16[128,128], index: 3, kind: input, shape index: {}]   ;;  %s873_s4 = inlined_call_operand.vmem [shape: f32[1,128], index: 4, kind: input, shape index: {}]   ;;  %s874_s5 = inlined_call_operand.hbm [shape: f32[72,128], index: 5, kind: output, shape index: {}]  }
   0x1   :  { %12 = vsyncpa [#allocation3 + $0x1], 0  ;;  %s716_s18 = smov 0   ;;  %s718_s19 = smov 0  }
   0x2   :  { %s720_s20 = smov 0   ;;  %s722_s21 = smov 0  }
   0x3 LB: > { %s737_s22 = sadd.s32 4294967295, %s681_s21   ;;  %s489_s23 = sadd.s32 4294967294, %s681_s21   ;;  %s681_s21 = sphi %s722_s21, %s881_s21   ;;  %s677_s20 = sphi %s720_s20, %s880_s20   ;;  %s673_s19 = sphi %s718_s19, %s879_s19   ;;  %s669_s18 = sphi %s716_s18, %s878_s18  }
   0x4   : > { %s741_s24 = sadd.s32 1, %s681_s21   ;;  %s135_s25 = sadd.s32 1, %s677_s20 }
   0x5   : > { %s132_s26 = ssub.s32 %s681_s21, %s741_s24  ;;  %p145_p0 = scmp.ne.s32.totalorder %s677_s20, %s673_s19 }
   0x6   : > { %p133_p1 = scmp.eq.s32.totalorder %s132_s26, 0  ;;  %p146_p2 = scmp.eq.s32.totalorder %s737_s22, 2 }
   0x7   : > { %p151_p3 = scmp.ne.s32.totalorder %s673_s19, %s669_s18  ;;  %p152_p4 = scmp.eq.s32.totalorder %s489_s23, 2 }
   0x8   : > { %s752_s27 = scalar_select %p133_p1, %s677_s20, %s135_s25  }
   0x9   : > { %p754_p5 = por %p146_p2, %p145_p0  ;;  %p758_p6 = por %p152_p4, %p151_p3 }
   0xa   : > { %p492_p7 = scmp.ge.s32.totalorder %s681_s21, 1  ;;  %p199_p8 = scmp.lt.s32.totalorder %s681_s21, 4 }
   0xc   : > { %p200_p9 = pnand %p492_p7, %p199_p8 }
   0xd   : > { %s768_s7 = sshll.u32 (!%p200_p9), %s737_s22, 2 }
   0xe   : > { %203 = sbr.rel (%p200_p9) target bundleno = 359 (0x167), region = 40  ;;  %p236_p10 = scmp.lt.s32.totalorder (!%p200_p9), %s768_s7, 8 }
  0x13   : > { %v548_v0 = vld [vmem:[%s870_s1 + $0x8] sm:$0xff]  ;;  %v556_v1 = vld [vmem:[%s872_s3 + $0x38] sm:$0xff]  ;;  %v547_v2 = vld [vmem:[%s870_s1] sm:$0xff]  ;;  %s237_s14 = scalar_select %p236_p10, %s768_s7, 8  ;;  %vm277_vm0 = vcmask 261120  }
  0x14   : > { %290 = vmatpush.bf16.msra.mxu0 %v548_v0  ;;  %377 = vmatpush.bf16.msra.mxu1 %v556_v1  ;;  %v555_v3 = vld [vmem:[%s872_s3 + $0x30] sm:$0xff]  ;;  %v554_v4 = vld [vmem:[%s872_s3 + $0x28] sm:$0xff]  ;;  %v553_v8 = vld [vmem:[%s872_s3 + $0x20] sm:$0xff]  ;;  %s413_s9 = ssub.s32 (%p754_p5), 9, %s768_s7 }
  0x15   : > { %558 = vmatpush.bf16.msra.mxu2 %v556_v1  ;;  %s495_s15 = sshll.u32 %s237_s14, 3  ;;  %v552_v12 = vld [vmem:[%s872_s3 + $0x18] sm:$0xff]  ;;  %v551_v13 = vld [vmem:[%s872_s3 + $0x10] sm:$0xff]  ;;  %v550_v14 = vld [vmem:[%s872_s3 + $0x8] sm:$0xff]  ;;  %p414_p11 = scmp.lt.s32.totalorder (%p754_p5), %s413_s9, 4 }
  0x16   : > { %s239_s23 = scalar_lea.vmem %s869_s0, %s495_s15  ;;  %v549_v15 = vld [vmem:[%s872_s3] sm:$0xff] }
  0x17   : > { %v251_v5 = vld [vmem:[%s239_s23] sm:$0xff]  ;;  %v252_v6 = vld [vmem:[%s239_s23 + $0x8] sm:$0xff]  ;;  %v253_v9 = vld [vmem:[%s239_s23 + $0x10] sm:$0xff] }
  0x18   : > { %291 = vmatpush.bf16.msra.mxu0 %v547_v2  ;;  %378 = vmatpush.bf16.msra.mxu1 %v555_v3  ;;  %v255_v7 = vpack.c.bf16 %v252_v6, %v251_v5  ;;  %v254_v10 = vld [vmem:[%s239_s23 + $0x18] sm:$0xff]  ;;  %v606_v17 = vld [vmem:[%s871_s2] ss:$0 sm:$0xff]  ;;  %s228_s23 = sand.u32 1, %s673_s19  }
  0x19   : > { %559 = vmatpush.bf16.msra.mxu2 %v555_v3  ;;  %v256_v11 = vpack.c.bf16 %v254_v10, %v253_v9  ;;  %v607_v31 = vld [vmem:[%s873_s4] ss:$0 sm:$0xff]  ;;  %s493_s30 = sshll.u32 %s228_s23, 5  ;;  %s809_s8 = scalar_lea.sflag [#allocation3], %s228_s23 }
  0x1a   : > { %s230_s6 = scalar_lea.vmem [#allocation2], %s493_s30 }
  0x1b   : > { %504 = vmatmul.msk.bf16.vlgmr.msra.gmra.mxu0 %vm277_vm0, %v255_v7 }
  0x1c   : > { %379 = vmatpush.bf16.msra.mxu1 %v554_v4 }
  0x1d   : > { %560 = vmatpush.bf16.msra.mxu2 %v554_v4 }
  0x20   : > { %380 = vmatpush.bf16.msra.mxu1 %v553_v8 }
  0x21   : > { %561 = vmatpush.bf16.msra.mxu2 %v553_v8 }
  0x24   : > { %381 = vmatpush.bf16.msra.mxu1 %v552_v12 }
  0x25   : > { %562 = vmatpush.bf16.msra.mxu2 %v552_v12 }
  0x28   : > { %382 = vmatpush.bf16.msra.mxu1 %v551_v13 }
  0x29   : > { %563 = vmatpush.bf16.msra.mxu2 %v551_v13 }
  0x2b   : > { %505 = vmatmul.msk.bf16.gmra.mxu0 %vm277_vm0, %v256_v11 }
  0x2c   : > { %383 = vmatpush.bf16.msra.mxu1 %v550_v14 }
  0x2d   : > { %564 = vmatpush.bf16.msra.mxu2 %v550_v14 }
  0x30   : > { %384 = vmatpush.bf16.msra.mxu1 %v549_v15 }
  0x31   : > { %565 = vmatpush.bf16.msra.mxu2 %v549_v15 }
  0x98   : > { %v293_v16 = vpop.f32.mrf.mxu0 }
  0x99   : > { %v294_v18 = vadd.f32 %v606_v17, %v293_v16 }
  0x9b   : > { %v303_v21 = vmax.f32 %v294_v18, 0.0 }
  0xa0   : > { %v295_v19 = vpop.f32.mrf.mxu0 }
  0xa1   : > { %v296_v20 = vadd.f32 %v606_v17, %v295_v19 }
  0xa3   : > { %v304_v22 = vmax.f32 %v296_v20, 0.0 }
  0xa5   : > { %v307_v23 = vpack.c.bf16 %v304_v22, %v303_v21 }
  0xa7   : > { %385 = vmatmul.bf16.vlgmr.msra.gmra.mxu1 %v307_v23 }
  0xa8   : > { %v298_v24 = vpop.f32.mrf.mxu0 }
  0xa9   : > { %v299_v25 = vadd.f32 %v606_v17, %v298_v24 }
  0xab   : > { %v305_v28 = vmax.f32 %v299_v25, 0.0 }
  0xb0   : > { %v300_v26 = vpop.f32.mrf.mxu0 }
  0xb1   : > { %v301_v27 = vadd.f32 %v606_v17, %v300_v26 }
  0xb3   : > { %v306_v29 = vmax.f32 %v301_v27, 0.0 }
  0xb5   : > { %v308_v30 = vpack.c.bf16 %v306_v29, %v305_v28 }
  0xb7   : > { %390 = vmatmul.bf16.vlgmr.msra.gmra.mxu2 %v308_v30 }
 0x124   : > { %v386_v32 = vpop.f32.mrf.mxu1 }
 0x125   : > { %v387_v33 = vadd.f32 %v607_v31, %v386_v32 }
 0x127   : > { %v396_v34 = vmax.f32 %v387_v33, 0.0 }
 0x129   : > { %400 = vst [vmem:[%s230_s6] sm:$0xff] %v396_v34 }
 0x12c   : > { %v388_v35 = vpop.f32.mrf.mxu1 }
 0x12d   : > { %v389_v36 = vadd.f32 %v607_v31, %v388_v35 }
 0x12f   : > { %v397_v37 = vmax.f32 %v389_v36, 0.0 }
 0x131   : > { %401 = vst [vmem:[%s230_s6 + $0x8] sm:$0xff] %v397_v37 }
 0x13a   : > { %v391_v38 = vpop.f32.mrf.mxu2 }
 0x13b   : > { %v392_v39 = vadd.f32 %v607_v31, %v391_v38 }
 0x13d   : > { %v398_v40 = vmax.f32 %v392_v39, 0.0 }
 0x13f   : > { %402 = vst [vmem:[%s230_s6 + $0x10] sm:$0xff] %v398_v40 }
 0x142   : > { %v393_v41 = vpop.f32.mrf.mxu2 }
 0x143   : > { %v394_v42 = vadd.f32 %v607_v31, %v393_v41  ;;  %411 = sbr.rel (!%p754_p5) target bundleno = 359 (0x167), region = 44 }
 0x145   : > { %v399_v43 = vmax.f32 %v394_v42, 0.0 }
 0x147   : > { %403 = vst [vmem:[%s230_s6 + $0x18] sm:$0xff] %v399_v43 }
 0x148   : > { %s883_s9 = smov (!%p414_p11, %s413_s9), 4 }
 0x149   : > { %s540_s10 = sshll.u32 %s883_s9, 3 }
 0x14a   : > { %s417_s11 = ssub.s32 32, %s540_s10 }
 0x14b   : > { %s418_s12 = sshll.u32 %s417_s11, 4 }
 0x14c   : > { %419 = vsyncadd %s809_s8, %s418_s12  ;;  %p818_p12 = scmp.ne.s32.totalorder %s540_s10, 0  ;;  %s557_s28 = sshll.u32 %s737_s22, 5 }
 0x14d   : > { %s422_s7 = scalar_lea.hbm %s874_s5, %s557_s28  ;;  %s424_s16 = sshll.u32 %s230_s6, 4  ;;  %s826_s16 = int_to_ptr.vmem [resolvable:$true] %s424_s16 }
 0x14e   : > { %s426_s17 = sshll.u32 %s422_s7, 4  ;;  %s544_s23 = sshll.u32 %s883_s9, 7  ;;  %s828_s17 = int_to_ptr.hbm [resolvable:$true] %s426_s17 }
 0x14f   : > { %s608_s25 = sshra.s32 %s826_s16, 4  ;;  %s610_s26 = sshrl.u32 %s544_s23, 4  ;;  %s609_s25 = int_to_ptr.vmem [resolvable:$true] %s608_s25 }
 0x150   : > { %s615_s30 = scalar_lea.vmem %s609_s25, %s610_s26  ;;  %s683_s22 = smov [#allocation2]  }
 0x151   : > { %p616_p13 = scmp.ne.s32.totalorder %s609_s25, %s615_s30  ;;  %s619_s10 = scalar_lea.vmem %s683_s22, 64 }
 0x152   : > { %p621_p2 = scmp.lt.s32.totalorder %s619_s10, %s615_s30 }
 0x153   : > { %p617_p0 = pnand %p616_p13, %p818_p12 }
 0x155   : > { %p618_p1 = pneg %p617_p0 }
 0x157   : > { %p623_p3 = pnand %p621_p2, %p618_p1 }
 0x159   : > { %626 = shalt.err (!%p623_p3)
}
 0x15a   : > { %s627_s6 = sshra.s32 %s828_s17, 4  ;;  %s638_s14 = scalar_lea.hbm %s874_s5, 72  ;;  %s628_s6 = int_to_ptr.hbm [resolvable:$true] %s627_s6 }
 0x15b   : > { %s634_s11 = scalar_lea.hbm %s628_s6, %s610_s26  ;;  %p639_p8 = scmp.lt.s32.totalorder %s628_s6, %s874_s5 }
 0x15c   : > { %p635_p4 = scmp.ne.s32.totalorder %s628_s6, %s634_s11  ;;  %p640_p9 = scmp.lt.s32.totalorder %s638_s14, %s634_s11 }
 0x15e   : > { %p636_p5 = pnand %p635_p4, %p818_p12  ;;  %p641_p10 = por %p640_p9, %p639_p8 }
 0x160   : > { %p637_p7 = pneg %p636_p5 }
 0x162   : > { %p642_p11 = pnand %p641_p10, %p637_p7 }
 0x164   : > { %645 = shalt.err (!%p642_p11)
}
 0x165   : > { %s684_s25 = smov 128   ;;  %s685_s26 = smov 8  }
 0x166   : > { %432 = dma.vmem_to_hbm [thread:$0]  (%p818_p12), %s826_s16, %s544_s23, %s828_s17, %s809_s8, %s684_s25, %s684_s25, %s685_s26  }
 0x167 PF: > { %p571_p13 = scmp.ge.s32.totalorder %s681_s21, 2  ;;  %s441_s30 = sand.u32 1, %s669_s18  }
 0x168   : > { %s442_s22 = scalar_lea.sflag [#allocation3], %s441_s30 }
 0x169   : > { %p568_p0 = pnand %p571_p13, %p758_p6 }
 0x16b   : > { %p569_p1 = pneg %p568_p0 }
 0x16d   : > { %664 = dma.done.wait (%p569_p1), %s442_s22, 512  }
 0x16e   : > { %666 = vsyncadd (%p569_p1), %s442_s22, 4294966784  ;;  %p15_p2 = scmp.ge.s32.totalorder %s741_s24, 5   ;;  %s878_s18 = smov %s673_s19 }
 0x16f   : > { %s879_s19 = smov %s677_s20  ;;  %s880_s20 = smov %s752_s27 }
 0x170   : > { %s881_s21 = smov %s741_s24  ;;  %17 = sbr.rel (!%p15_p2) target bundleno = 3 (0x3), region = 75 }
 0x175   :  { %448 = vsyncpa [#allocation3], 1 }
 0x176   :  { %450 = vsyncpa [#allocation3 + $0x1], 1 }

// kernel: tpu_custom_call.1
= control target key start
LH: loop header
LB: loop body
LE: loop exit
PB: predicated region body
PF: predicated region fallthrough
CT: control target
= control target key end

     0   :  { %10 = vsyncpa [#allocation3], 0  ;;  %s869_s0 = inlined_call_operand.vmem [shape: f32[72,32], index: 0, kind: input, shape index: {}]   ;;  %s870_s1 = inlined_call_operand.vmem [shape: bf16[32,128], index: 1, kind: input, shape index: {}]   ;;  %s871_s2 = inlined_call_operand.vmem [shape: f32[1,128], index: 2, kind: input, shape index: {}]   ;;  %s872_s3 = inlined_call_operand.vmem [shape: bf16[128,128], index: 3, kind: input, shape index: {}]   ;;  %s873_s4 = inlined_call_operand.vmem [shape: f32[1,128], index: 4, kind: input, shape index: {}]   ;;  %s874_s5 = inlined_call_operand.hbm [shape: f32[72,128], index: 5, kind: output, shape index: {}]  }
   0x1   :  { %12 = vsyncpa [#allocation3 + $0x1], 0  ;;  %s716_s18 = smov 0   ;;  %s718_s19 = smov 0  }
   0x2   :  { %s720_s20 = smov 0   ;;  %s722_s21 = smov 0  }
   0x3 LB: > { %s737_s22 = sadd.s32 4294967295, %s681_s21   ;;  %s489_s23 = sadd.s32 4294967294, %s681_s21   ;;  %s681_s21 = sphi %s722_s21, %s881_s21   ;;  %s677_s20 = sphi %s720_s20, %s880_s20   ;;  %s673_s19 = sphi %s718_s19, %s879_s19   ;;  %s669_s18 = sphi %s716_s18, %s878_s18  }
   0x4   : > { %s741_s24 = sadd.s32 1, %s681_s21   ;;  %s135_s25 = sadd.s32 1, %s677_s20 }
   0x5   : > { %s132_s26 = ssub.s32 %s681_s21, %s741_s24  ;;  %p145_p0 = scmp.ne.s32.totalorder %s677_s20, %s673_s19 }
   0x6   : > { %p133_p1 = scmp.eq.s32.totalorder %s132_s26, 0  ;;  %p146_p2 = scmp.eq.s32.totalorder %s737_s22, 2 }
   0x7   : > { %p151_p3 = scmp.ne.s32.totalorder %s673_s19, %s669_s18  ;;  %p152_p4 = scmp.eq.s32.totalorder %s489_s23, 2 }
   0x8   : > { %s752_s27 = scalar_select %p133_p1, %s677_s20, %s135_s25  }
   0x9   : > { %p754_p5 = por %p146_p2, %p145_p0  ;;  %p758_p6 = por %p152_p4, %p151_p3 }
   0xa   : > { %p492_p7 = scmp.ge.s32.totalorder %s681_s21, 1  ;;  %p199_p8 = scmp.lt.s32.totalorder %s681_s21, 4 }
   0xc   : > { %p200_p9 = pnand %p492_p7, %p199_p8 }
   0xd   : > { %s768_s7 = sshll.u32 (!%p200_p9), %s737_s22, 2 }
   0xe   : > { %203 = sbr.rel (%p200_p9) target bundleno = 359 (0x167), region = 40  ;;  %p236_p10 = scmp.lt.s32.totalorder (!%p200_p9), %s768_s7, 8 }
  0x13   : > { %v548_v0 = vld [vmem:[%s870_s1 + $0x8] sm:$0xff]  ;;  %v556_v1 = vld [vmem:[%s872_s3 + $0x38] sm:$0xff]  ;;  %v547_v2 = vld [vmem:[%s870_s1] sm:$0xff]  ;;  %s237_s14 = scalar_select %p236_p10, %s768_s7, 8  ;;  %vm277_vm0 = vcmask 261120  }
  0x14   : > { %290 = vmatpush.bf16.msra.mxu0 %v548_v0  ;;  %377 = vmatpush.bf16.msra.mxu1 %v556_v1  ;;  %v555_v3 = vld [vmem:[%s872_s3 + $0x30] sm:$0xff]  ;;  %v554_v4 = vld [vmem:[%s872_s3 + $0x28] sm:$0xff]  ;;  %v553_v8 = vld [vmem:[%s872_s3 + $0x20] sm:$0xff]  ;;  %s413_s9 = ssub.s32 (%p754_p5), 9, %s768_s7 }
  0x15   : > { %558 = vmatpush.bf16.msra.mxu2 %v556_v1  ;;  %s495_s15 = sshll.u32 %s237_s14, 3  ;;  %v552_v12 = vld [vmem:[%s872_s3 + $0x18] sm:$0xff]  ;;  %v551_v13 = vld [vmem:[%s872_s3 + $0x10] sm:$0xff]  ;;  %v550_v14 = vld [vmem:[%s872_s3 + $0x8] sm:$0xff]  ;;  %p414_p11 = scmp.lt.s32.totalorder (%p754_p5), %s413_s9, 4 }
  0x16   : > { %s239_s23 = scalar_lea.vmem %s869_s0, %s495_s15  ;;  %v549_v15 = vld [vmem:[%s872_s3] sm:$0xff] }
  0x17   : > { %v251_v5 = vld [vmem:[%s239_s23] sm:$0xff]  ;;  %v252_v6 = vld [vmem:[%s239_s23 + $0x8] sm:$0xff]  ;;  %v253_v9 = vld [vmem:[%s239_s23 + $0x10] sm:$0xff] }
  0x18   : > { %291 = vmatpush.bf16.msra.mxu0 %v547_v2  ;;  %378 = vmatpush.bf16.msra.mxu1 %v555_v3  ;;  %v255_v7 = vpack.c.bf16 %v252_v6, %v251_v5  ;;  %v254_v10 = vld [vmem:[%s239_s23 + $0x18] sm:$0xff]  ;;  %v606_v17 = vld [vmem:[%s871_s2] ss:$0 sm:$0xff]  ;;  %s228_s23 = sand.u32 1, %s673_s19  }
  0x19   : > { %559 = vmatpush.bf16.msra.mxu2 %v555_v3  ;;  %v256_v11 = vpack.c.bf16 %v254_v10, %v253_v9  ;;  %v607_v31 = vld [vmem:[%s873_s4] ss:$0 sm:$0xff]  ;;  %s493_s30 = sshll.u32 %s228_s23, 5  ;;  %s809_s8 = scalar_lea.sflag [#allocation3], %s228_s23 }
  0x1a   : > { %s230_s6 = scalar_lea.vmem [#allocation2], %s493_s30 }
  0x1b   : > { %504 = vmatmul.msk.bf16.vlgmr.msra.gmra.mxu0 %vm277_vm0, %v255_v7 }
  0x1c   : > { %379 = vmatpush.bf16.msra.mxu1 %v554_v4 }
  0x1d   : > { %560 = vmatpush.bf16.msra.mxu2 %v554_v4 }
  0x20   : > { %380 = vmatpush.bf16.msra.mxu1 %v553_v8 }
  0x21   : > { %561 = vmatpush.bf16.msra.mxu2 %v553_v8 }
  0x24   : > { %381 = vmatpush.bf16.msra.mxu1 %v552_v12 }
  0x25   : > { %562 = vmatpush.bf16.msra.mxu2 %v552_v12 }
  0x28   : > { %382 = vmatpush.bf16.msra.mxu1 %v551_v13 }
  0x29   : > { %563 = vmatpush.bf16.msra.mxu2 %v551_v13 }
  0x2b   : > { %505 = vmatmul.msk.bf16.gmra.mxu0 %vm277_vm0, %v256_v11 }
  0x2c   : > { %383 = vmatpush.bf16.msra.mxu1 %v550_v14 }
  0x2d   : > { %564 = vmatpush.bf16.msra.mxu2 %v550_v14 }
  0x30   : > { %384 = vmatpush.bf16.msra.mxu1 %v549_v15 }
  0x31   : > { %565 = vmatpush.bf16.msra.mxu2 %v549_v15 }
  0x98   : > { %v293_v16 = vpop.f32.mrf.mxu0 }
  0x99   : > { %v294_v18 = vadd.f32 %v606_v17, %v293_v16 }
  0x9b   : > { %v303_v21 = vmax.f32 %v294_v18, 0.0 }
  0xa0   : > { %v295_v19 = vpop.f32.mrf.mxu0 }
  0xa1   : > { %v296_v20 = vadd.f32 %v606_v17, %v295_v19 }
  0xa3   : > { %v304_v22 = vmax.f32 %v296_v20, 0.0 }
  0xa5   : > { %v307_v23 = vpack.c.bf16 %v304_v22, %v303_v21 }
  0xa7   : > { %385 = vmatmul.bf16.vlgmr.msra.gmra.mxu1 %v307_v23 }
  0xa8   : > { %v298_v24 = vpop.f32.mrf.mxu0 }
  0xa9   : > { %v299_v25 = vadd.f32 %v606_v17, %v298_v24 }
  0xab   : > { %v305_v28 = vmax.f32 %v299_v25, 0.0 }
  0xb0   : > { %v300_v26 = vpop.f32.mrf.mxu0 }
  0xb1   : > { %v301_v27 = vadd.f32 %v606_v17, %v300_v26 }
  0xb3   : > { %v306_v29 = vmax.f32 %v301_v27, 0.0 }
  0xb5   : > { %v308_v30 = vpack.c.bf16 %v306_v29, %v305_v28 }
  0xb7   : > { %390 = vmatmul.bf16.vlgmr.msra.gmra.mxu2 %v308_v30 }
 0x124   : > { %v386_v32 = vpop.f32.mrf.mxu1 }
 0x125   : > { %v387_v33 = vadd.f32 %v607_v31, %v386_v32 }
 0x127   : > { %v396_v34 = vmax.f32 %v387_v33, 0.0 }
 0x129   : > { %400 = vst [vmem:[%s230_s6] sm:$0xff] %v396_v34 }
 0x12c   : > { %v388_v35 = vpop.f32.mrf.mxu1 }
 0x12d   : > { %v389_v36 = vadd.f32 %v607_v31, %v388_v35 }
 0x12f   : > { %v397_v37 = vmax.f32 %v389_v36, 0.0 }
 0x131   : > { %401 = vst [vmem:[%s230_s6 + $0x8] sm:$0xff] %v397_v37 }
 0x13a   : > { %v391_v38 = vpop.f32.mrf.mxu2 }
 0x13b   : > { %v392_v39 = vadd.f32 %v607_v31, %v391_v38 }
 0x13d   : > { %v398_v40 = vmax.f32 %v392_v39, 0.0 }
 0x13f   : > { %402 = vst [vmem:[%s230_s6 + $0x10] sm:$0xff] %v398_v40 }
 0x142   : > { %v393_v41 = vpop.f32.mrf.mxu2 }
 0x143   : > { %v394_v42 = vadd.f32 %v607_v31, %v393_v41  ;;  %411 = sbr.rel (!%p754_p5) target bundleno = 359 (0x167), region = 44 }
 0x145   : > { %v399_v43 = vmax.f32 %v394_v42, 0.0 }
 0x147   : > { %403 = vst [vmem:[%s230_s6 + $0x18] sm:$0xff] %v399_v43 }
 0x148   : > { %s883_s9 = smov (!%p414_p11, %s413_s9), 4 }
 0x149   : > { %s540_s10 = sshll.u32 %s883_s9, 3 }
 0x14a   : > { %s417_s11 = ssub.s32 32, %s540_s10 }
 0x14b   : > { %s418_s12 = sshll.u32 %s417_s11, 4 }
 0x14c   : > { %419 = vsyncadd %s809_s8, %s418_s12  ;;  %p818_p12 = scmp.ne.s32.totalorder %s540_s10, 0  ;;  %s557_s28 = sshll.u32 %s737_s22, 5 }
 0x14d   : > { %s422_s7 = scalar_lea.hbm %s874_s5, %s557_s28  ;;  %s424_s16 = sshll.u32 %s230_s6, 4  ;;  %s826_s16 = int_to_ptr.vmem [resolvable:$true] %s424_s16 }
 0x14e   : > { %s426_s17 = sshll.u32 %s422_s7, 4  ;;  %s544_s23 = sshll.u32 %s883_s9, 7  ;;  %s828_s17 = int_to_ptr.hbm [resolvable:$true] %s426_s17 }
 0x14f   : > { %s608_s25 = sshra.s32 %s826_s16, 4  ;;  %s610_s26 = sshrl.u32 %s544_s23, 4  ;;  %s609_s25 = int_to_ptr.vmem [resolvable:$true] %s608_s25 }
 0x150   : > { %s615_s30 = scalar_lea.vmem %s609_s25, %s610_s26  ;;  %s683_s22 = smov [#allocation2]  }
 0x151   : > { %p616_p13 = scmp.ne.s32.totalorder %s609_s25, %s615_s30  ;;  %s619_s10 = scalar_lea.vmem %s683_s22, 64 }
 0x152   : > { %p621_p2 = scmp.lt.s32.totalorder %s619_s10, %s615_s30 }
 0x153   : > { %p617_p0 = pnand %p616_p13, %p818_p12 }
 0x155   : > { %p618_p1 = pneg %p617_p0 }
 0x157   : > { %p623_p3 = pnand %p621_p2, %p618_p1 }
 0x159   : > { %626 = shalt.err (!%p623_p3)
}
 0x15a   : > { %s627_s6 = sshra.s32 %s828_s17, 4  ;;  %s638_s14 = scalar_lea.hbm %s874_s5, 72  ;;  %s628_s6 = int_to_ptr.hbm [resolvable:$true] %s627_s6 }
 0x15b   : > { %s634_s11 = scalar_lea.hbm %s628_s6, %s610_s26  ;;  %p639_p8 = scmp.lt.s32.totalorder %s628_s6, %s874_s5 }
 0x15c   : > { %p635_p4 = scmp.ne.s32.totalorder %s628_s6, %s634_s11  ;;  %p640_p9 = scmp.lt.s32.totalorder %s638_s14, %s634_s11 }
 0x15e   : > { %p636_p5 = pnand %p635_p4, %p818_p12  ;;  %p641_p10 = por %p640_p9, %p639_p8 }
 0x160   : > { %p637_p7 = pneg %p636_p5 }
 0x162   : > { %p642_p11 = pnand %p641_p10, %p637_p7 }
 0x164   : > { %645 = shalt.err (!%p642_p11)
}
 0x165   : > { %s684_s25 = smov 128   ;;  %s685_s26 = smov 8  }
 0x166   : > { %432 = dma.vmem_to_hbm [thread:$0]  (%p818_p12), %s826_s16, %s544_s23, %s828_s17, %s809_s8, %s684_s25, %s684_s25, %s685_s26  }
 0x167 PF: > { %p571_p13 = scmp.ge.s32.totalorder %s681_s21, 2  ;;  %s441_s30 = sand.u32 1, %s669_s18  }
 0x168   : > { %s442_s22 = scalar_lea.sflag [#allocation3], %s441_s30 }
 0x169   : > { %p568_p0 = pnand %p571_p13, %p758_p6 }
 0x16b   : > { %p569_p1 = pneg %p568_p0 }
 0x16d   : > { %664 = dma.done.wait (%p569_p1), %s442_s22, 512  }
 0x16e   : > { %666 = vsyncadd (%p569_p1), %s442_s22, 4294966784  ;;  %p15_p2 = scmp.ge.s32.totalorder %s741_s24, 5   ;;  %s878_s18 = smov %s673_s19 }
 0x16f   : > { %s879_s19 = smov %s677_s20  ;;  %s880_s20 = smov %s752_s27 }
 0x170   : > { %s881_s21 = smov %s741_s24  ;;  %17 = sbr.rel (!%p15_p2) target bundleno = 3 (0x3), region = 75 }
 0x175   :  { %448 = vsyncpa [#allocation3], 1 }
 0x176   :  { %450 = vsyncpa [#allocation3 + $0x1], 1 }

</bundles_post_ra>
